<compile_context>
chip_gen: v7x
topology: tpu7x:2x2x1
jax: 0.10.0
libtpu: 0.0.40
codegen_flags: <defaults>
</compile_context>

<pallas_src>
import functools

import jax
import jax.numpy as jnp
import numpy as np
from jax.experimental import pallas as pl
from jax.experimental.pallas import tpu as pltpu


# --------------------------- block / VMEM sizing ------------------------------

_TILE_BYTES = 4 * 1024 * 1024      # ~4 MiB per (t, c, hw_blk) tile


@functools.lru_cache(maxsize=None)
def _vmem_cap():
    # Generation-aware scoped-VMEM ceiling: ~3/4 of physical VMEM
    # (~96 MiB on v5e/v6e with 128 MiB, ~48 MiB on v7x with 64 MiB).
    try:
        phys = getattr(pltpu.get_tpu_info(), "vmem_capacity_bytes", None)
    except Exception:
        phys = None
    if not phys:
        phys = 64 << 20
    return max(32 << 20, (int(phys) * 3) // 4)


def _choose_hw_block(t, c, hw, dtype, *, min_blocks=1):
    """Lane-axis (h*w) block: a multiple of 128 dividing hw, sized so one
    (t, c, hw_blk) tile is ~_TILE_BYTES.  Falls back to the full extent
    (always legal) when hw < 128 or has no lane-aligned divisor."""
    itemsize = jnp.dtype(dtype).itemsize
    budget_elems = max(1, _TILE_BYTES // itemsize)
    cap = max(128, (budget_elems // max(1, t * c)) // 128 * 128)
    if min_blocks > 1:                       # ensure >=2 parallel hw blocks
        cap = min(cap, max(128, ((hw // min_blocks) // 128) * 128))
    b = min(cap, (hw // 128) * 128)
    while b >= 128:
        if hw % b == 0:
            return b
        b -= 128
    return hw


def _vmem_limit(t, c, hw_blk, dtype, *, n_big):
    """Scoped-VMEM request: n_big double-buffered big tiles + headroom,
    accounting for sublane/lane padding, clamped to the per-chip ceiling."""
    itemsize = jnp.dtype(dtype).itemsize
    pack = max(1, 4 // itemsize)                       # sublane packing (8/16/32)
    c_pad = -(-c // (8 * pack)) * (8 * pack)
    hw_pad = -(-hw_blk // 128) * 128
    tile = t * c_pad * hw_pad * itemsize
    need = n_big * tile + (8 << 20)
    return int(min(max(need, 32 << 20), _vmem_cap()))


# ------------------------------ Pallas kernels --------------------------------

def _pool_kernel(x_ref, o_ref, *, inv_hw):
    # x_ref: (t, c, hw_blk) -> o_ref: (t, c) f32, resident across the hw axis.
    j = pl.program_id(1)

    @pl.when(j == 0)
    def _():
        o_ref[...] = jnp.zeros_like(o_ref)

    o_ref[...] += jnp.sum(x_ref[...].astype(jnp.float32), axis=-1)

    @pl.when(j == pl.num_programs(1) - 1)
    def _():
        o_ref[...] = o_ref[...] * inv_hw


def spatial_mean(x4):
    # x4: (n_batch, t, c, hw) -> pooled (n_batch, t, c) f32 (mean over hw).
    n_batch, t, c, hw = x4.shape
    hw_blk = _choose_hw_block(t, c, hw, x4.dtype)
    grid = (n_batch, hw // hw_blk)
    kern = functools.partial(_pool_kernel, inv_hw=1.0 / hw)
    return pl.pallas_call(
        kern,
        out_shape=jax.ShapeDtypeStruct((n_batch, t, c), jnp.float32),
        grid=grid,
        in_specs=[pl.BlockSpec((None, t, c, hw_blk), lambda b, j: (b, 0, 0, j))],
        out_specs=pl.BlockSpec((None, t, c), lambda b, j: (b, 0, 0)),
        compiler_params=pltpu.CompilerParams(
            dimension_semantics=("parallel", "arbitrary"),
            vmem_limit_bytes=_vmem_limit(t, c, hw_blk, x4.dtype, n_big=2)),
    )(x4)


def _temporal_conv_kernel(x_ref, coef_ref, o_ref, *, kernel_size, padding):
    # x_ref:    (t, c, hw_blk)       windowed input (lanes = h*w, sublanes = c)
    # coef_ref: (c, kernel_size*t)   f32; coef[c, k*t + j] = w[c, k] * act[c, j]
    # o_ref:    (t, c, hw_blk)       conv(gated x) + residual x
    # Each output slab is accumulated once in f32 registers and stored exactly
    # once (no o_ref read-modify-write, no gated-x temporary).
    t = x_ref.shape[0]
    coef = coef_ref[...]                               # tiny, loaded once
    for i in range(t):
        xi = x_ref[i].astype(jnp.float32)              # (c, hw_blk)
        acc = xi                                       # residual (pre-gating x)
        for k in range(kernel_size):
            j = i + k - padding                        # source time index
            if j < 0 or j >= t:
                continue                               # zero padding: skip tap
            xj = xi if j == i else x_ref[j].astype(jnp.float32)
            co = coef[:, k * t + j: k * t + j + 1]     # (c, 1) lane-broadcast
            acc = acc + co * xj
        o_ref[i] = acc.astype(o_ref.dtype)


def temporal_conv_residual(x4, coef, *, kernel_size, padding):
    # x4: (n_batch, t, c, hw); coef: (n_batch, c, kernel_size*t) f32.
    n_batch, t, c, hw = x4.shape
    hw_blk = _choose_hw_block(t, c, hw, x4.dtype,
                              min_blocks=2 if n_batch < 2 else 1)
    grid = (n_batch, hw // hw_blk)
    kern = functools.partial(_temporal_conv_kernel,
                             kernel_size=kernel_size, padding=padding)
    return pl.pallas_call(
        kern,
        out_shape=jax.ShapeDtypeStruct(x4.shape, x4.dtype),
        grid=grid,
        in_specs=[
            pl.BlockSpec((None, t, c, hw_blk), lambda b, j: (b, 0, 0, j)),
            pl.BlockSpec((None, c, kernel_size * t), lambda b, j: (b, 0, 0)),
        ],
        out_specs=pl.BlockSpec((None, t, c, hw_blk), lambda b, j: (b, 0, 0, j)),
        compiler_params=pltpu.CompilerParams(
            dimension_semantics=("parallel", "parallel"),
            vmem_limit_bytes=_vmem_limit(t, c, hw_blk, x4.dtype, n_big=4)),
    )(x4, coef)


# --------------------------------- JAX glue -----------------------------------

def sequence_windows(x, labels, *, window_size, window_stride):
    # shuffle == 0 path of SequenceWindows: pure window extraction (indexing glue).
    # TODO(synk): shuffle modes 1/2 (host-side np.random permutations) not implemented.
    n, c, h, w = x.shape
    num_new = (w - window_size) // window_stride + 1
    wins = [x[:, :, :, j * window_stride: j * window_stride + window_size]
            for j in range(num_new)]
    new_x = jnp.stack(wins, axis=1).reshape(n * num_new, c, h, window_size)
    new_labels = jnp.repeat(labels.astype(jnp.float32), num_new)
    return new_x, new_labels, 0, None


def batchnorm1d_train(x, gamma, beta, eps=1e-5):
    # PyTorch BatchNorm1d in training mode (batch statistics, biased variance).
    axes = (0,) if x.ndim == 2 else (0, 2)
    mean = jnp.mean(x, axis=axes, keepdims=True)
    var = jnp.mean((x - mean) ** 2, axis=axes, keepdims=True)
    shape = (1, -1) + (1,) * (x.ndim - 2)
    return (x - mean) / jnp.sqrt(var + eps) * gamma.reshape(shape) + beta.reshape(shape)


def global_branch(pooled, params):
    # pooled: (n_batch*c, t) -> softmax conv kernel (n_batch*c, K)
    y = pooled @ params["g_w1"].T
    y = batchnorm1d_train(y, params["g_bn_g"], params["g_bn_b"])
    y = jax.nn.relu(y)
    y = y @ params["g_w2"].T
    return jax.nn.softmax(y, axis=-1)


def local_branch(pooled_nct, params, kernel_size):
    # pooled_nct: (n_batch, C, t) -> sigmoid activation (n_batch, C, t)
    p = kernel_size // 2
    y = jax.lax.conv_general_dilated(
        pooled_nct, params["l_w1"], window_strides=(1,), padding=[(p, p)],
        dimension_numbers=("NCH", "OIH", "NCH"))
    y = batchnorm1d_train(y, params["l_bn_g"], params["l_bn_b"])
    y = jax.nn.relu(y)
    y = jax.lax.conv_general_dilated(
        y, params["l_w2"], window_strides=(1,), padding=[(0, 0)],
        dimension_numbers=("NCH", "OIH", "NCH"))
    return jax.nn.sigmoid(y)


def temporal_attention_forward(x, labels, params, *, in_channels, n_segment,
                               window_size, window_stride, kernel_size,
                               stride, padding):
    # TODO(synk): stride != 1 changes the output temporal extent; not supported.
    assert stride == 1
    xw, new_labels, shuffle, sorted_permu = sequence_windows(
        x, labels, window_size=window_size, window_stride=window_stride)
    nt, c, h, w = xw.shape
    assert c == in_channels
    t = n_segment
    assert nt % t == 0
    n_batch = nt // t
    hw = h * w
    assert t + 2 * padding - kernel_size + 1 == t, "requires 2*padding == kernel_size-1"

    # Natural-layout 4-D view (free reshape, NO transpose): the nt axis already
    # factors as (n_batch major, t minor), and the kernel output in the same
    # layout reshapes freely back to (nt, c, h, w).
    x4 = xw.reshape(n_batch, t, c, hw)

    # Pooling read is the first touch of the data and cannot be fused into the
    # conv pass (its output gates the conv weights via the Global/Local MLPs).
    pooled = spatial_mean(x4)                               # Pallas, (n_batch, t, c) f32
    pooled_nct = jnp.transpose(pooled, (0, 2, 1))           # tiny (n_batch, c, t)
    conv_kernel = global_branch(pooled_nct.reshape(n_batch * c, t), params)
    conv_kernel = conv_kernel.reshape(n_batch, c, kernel_size)
    local_act = local_branch(pooled_nct, params, kernel_size)   # (n_batch, c, t)

    # Fold the sigmoid gating into per-(tap, source-time, channel) coefficients
    # (tiny: n_batch*c*K*t elements, computed once in XLA in f32).
    coef = conv_kernel[:, :, :, None] * local_act[:, :, None, :]  # (nb, c, K, t)
    coef = coef.reshape(n_batch, c, kernel_size * t).astype(jnp.float32)

    out4 = temporal_conv_residual(x4, coef,                  # Pallas hot path
                                  kernel_size=kernel_size, padding=padding)
    out = out4.reshape(nt, c, h, w)                          # free view
    return out, new_labels, shuffle, sorted_permu


# ----------------------------------- main --------------------------------------

if __name__ == "__main__":
    # Small, consistent configuration.
    in_channels = 8
    n_segment = 2
    window_size = 8
    window_stride = 4
    kernel_size = 3
    stride = 1
    padding = 1

    num_samples, h, w_full = 2, 4, 16
    key = jax.random.PRNGKey(0)
    k_x, k1, k2, k3, k4 = jax.random.split(key, 5)

    x = jax.random.normal(k_x, (num_samples, in_channels, h, w_full), jnp.float32)
    labels = jnp.arange(num_samples, dtype=jnp.float32)

    t = n_segment
    params = {
        # GlobalBranch: Linear(t, 2t) -> BN1d(2t) -> ReLU -> Linear(2t, K) -> Softmax
        "g_w1": 0.1 * jax.random.normal(k1, (2 * t, t), jnp.float32),
        "g_bn_g": jnp.ones((2 * t,), jnp.float32),
        "g_bn_b": jnp.zeros((2 * t,), jnp.float32),
        "g_w2": 0.1 * jax.random.normal(k2, (kernel_size, 2 * t), jnp.float32),
        # LocalBranch: Conv1d(C, C//4, K) -> BN1d -> ReLU -> Conv1d(C//4, C, 1) -> Sigmoid
        "l_w1": 0.1 * jax.random.normal(k3, (in_channels // 4, in_channels, kernel_size),
                                        jnp.float32),
        "l_bn_g": jnp.ones((in_channels // 4,), jnp.float32),
        "l_bn_b": jnp.zeros((in_channels // 4,), jnp.float32),
        "l_w2": 0.1 * jax.random.normal(k4, (in_channels, in_channels // 4, 1), jnp.float32),
    }

    out, new_labels, shuffle, sorted_permu = temporal_attention_forward(
        x, labels, params,
        in_channels=in_channels, n_segment=n_segment,
        window_size=window_size, window_stride=window_stride,
        kernel_size=kernel_size, stride=stride, padding=padding)
    out = jax.block_until_ready(out)
    new_labels = jax.block_until_ready(new_labels)

    # --- pure-JAX reference for the Pallas-kernel portions (sanity check) ---
    xw_ref, _, _, _ = sequence_windows(x, labels, window_size=window_size,
                                       window_stride=window_stride)
    nt, c, hh, ww = xw_ref.shape
    n_batch = nt // t
    new_x_ref = xw_ref.reshape(n_batch, t, c, hh, ww).transpose(0, 2, 1, 3, 4)
    x3_ref = new_x_ref.reshape(n_batch * c, t, hh * ww)
    pooled_ref = jnp.mean(x3_ref, axis=-1)
    ck_ref = global_branch(pooled_ref, params)
    la_ref = local_branch(pooled_ref.reshape(n_batch, c, t), params,
                          kernel_size).reshape(n_batch * c, t)
    xs_ref = x3_ref * la_ref[:, :, None]
    xp_ref = jnp.pad(xs_ref, ((0, 0), (padding, padding), (0, 0)))
    conv_ref = sum(ck_ref[:, k][:, None, None] * xp_ref[:, k:k + t, :]
                   for k in range(kernel_size))
    out_ref = ((conv_ref + x3_ref).reshape(n_batch, c, t, hh, ww)
               .transpose(0, 2, 1, 3, 4).reshape(nt, c, hh, ww))

    np.testing.assert_allclose(np.asarray(out), np.asarray(out_ref),
                               rtol=1e-5, atol=1e-5)
    print("KERNEL_OK")
</pallas_src>

<mosaic_0001>
module attributes {stable_mosaic.version = 11 : i64} {
  func.func @_pool_kernel(%arg0: i32, %arg1: i32, %arg2: memref<1x2x8x32xf32, #tpu.memory_space<vmem>>, %arg3: memref<1x2x8xf32, #tpu.memory_space<vmem>>) attributes {dimension_semantics = [#tpu.dimension_semantics<parallel>, #tpu.dimension_semantics<arbitrary>], iteration_bounds = array<i64: 3, 1>, scalar_prefetch = 0 : i64, scratch_operands = 0 : i64, tpu.core_type = #tpu.core_type<tc>, window_params = [{transform_indices = @transform_0, window_bounds = array<i64: 1, 2, 8, 32>}, {transform_indices = @transform_1, window_bounds = array<i64: 1, 2, 8>}]} {
    %c0_i32 = arith.constant 0 : i32
    %0 = arith.cmpi eq, %arg1, %c0_i32 : i32
    %1 = arith.extui %0 : i1 to i32
    %c0_i32_0 = arith.constant 0 : i32
    %2 = arith.cmpi ne, %1, %c0_i32_0 : i32
    scf.if %2 {
      %cst_12 = arith.constant 0.000000e+00 : f32
      %15 = vector.broadcast %cst_12 : f32 to vector<2x8xf32>
      %c0_13 = arith.constant 0 : index
      %c0_14 = arith.constant 0 : index
      %c0_15 = arith.constant 0 : index
      %16 = vector.load %arg3[%c0_13, %c0_14, %c0_15] : memref<1x2x8xf32, #tpu.memory_space<vmem>>, vector<1x2x8xf32>
      %17 = vector.shape_cast %16 : vector<1x2x8xf32> to vector<2x8xf32>
      %18 = vector.shape_cast %15 : vector<2x8xf32> to vector<1x2x8xf32>
      tpu.vector_store %arg3[%c0_13, %c0_14, %c0_15], %18 {strides = array<i32>} : memref<1x2x8xf32, #tpu.memory_space<vmem>>, vector<1x2x8xf32>,
    } else {
    }
    %c0 = arith.constant 0 : index
    %c0_1 = arith.constant 0 : index
    %c0_2 = arith.constant 0 : index
    %3 = vector.load %arg3[%c0, %c0_1, %c0_2] : memref<1x2x8xf32, #tpu.memory_space<vmem>>, vector<1x2x8xf32>
    %4 = vector.shape_cast %3 : vector<1x2x8xf32> to vector<2x8xf32>
    %c0_3 = arith.constant 0 : index
    %c0_4 = arith.constant 0 : index
    %c0_5 = arith.constant 0 : index
    %c0_6 = arith.constant 0 : index
    %5 = vector.load %arg2[%c0_3, %c0_4, %c0_5, %c0_6] : memref<1x2x8x32xf32, #tpu.memory_space<vmem>>, vector<1x2x8x32xf32>
    %6 = vector.shape_cast %5 : vector<1x2x8x32xf32> to vector<2x8x32xf32>
    %cst = arith.constant dense<0.000000e+00> : vector<2x8xf32>
    %7 = vector.multi_reduction <add>, %6, %cst [2] : vector<2x8x32xf32> to vector<2x8xf32>
    %8 = arith.addf %4, %7 : vector<2x8xf32>
    %c0_7 = arith.constant 0 : index
    %c0_8 = arith.constant 0 : index
    %c0_9 = arith.constant 0 : index
    %9 = vector.load %arg3[%c0_7, %c0_8, %c0_9] : memref<1x2x8xf32, #tpu.memory_space<vmem>>, vector<1x2x8xf32>
    %10 = vector.shape_cast %9 : vector<1x2x8xf32> to vector<2x8xf32>
    %11 = vector.shape_cast %8 : vector<2x8xf32> to vector<1x2x8xf32>
    tpu.vector_store %arg3[%c0_7, %c0_8, %c0_9], %11 {strides = array<i32>} : memref<1x2x8xf32, #tpu.memory_space<vmem>>, vector<1x2x8xf32>,
    %c0_i32_10 = arith.constant 0 : i32
    %12 = arith.cmpi eq, %arg1, %c0_i32_10 : i32
    %13 = arith.extui %12 : i1 to i32
    %c0_i32_11 = arith.constant 0 : i32
    %14 = arith.cmpi ne, %13, %c0_i32_11 : i32
    scf.if %14 {
      %c0_12 = arith.constant 0 : index
      %c0_13 = arith.constant 0 : index
      %c0_14 = arith.constant 0 : index
      %15 = vector.load %arg3[%c0_12, %c0_13, %c0_14] : memref<1x2x8xf32, #tpu.memory_space<vmem>>, vector<1x2x8xf32>
      %16 = vector.shape_cast %15 : vector<1x2x8xf32> to vector<2x8xf32>
      %cst_15 = arith.constant 3.125000e-02 : f32
      %17 = vector.broadcast %cst_15 : f32 to vector<2x8xf32>
      %18 = arith.mulf %16, %17 : vector<2x8xf32>
      %c0_16 = arith.constant 0 : index
      %c0_17 = arith.constant 0 : index
      %c0_18 = arith.constant 0 : index
      %19 = vector.load %arg3[%c0_16, %c0_17, %c0_18] : memref<1x2x8xf32, #tpu.memory_space<vmem>>, vector<1x2x8xf32>
      %20 = vector.shape_cast %19 : vector<1x2x8xf32> to vector<2x8xf32>
      %21 = vector.shape_cast %18 : vector<2x8xf32> to vector<1x2x8xf32>
      tpu.vector_store %arg3[%c0_16, %c0_17, %c0_18], %21 {strides = array<i32>} : memref<1x2x8xf32, #tpu.memory_space<vmem>>, vector<1x2x8xf32>,
    } else {
    }
    return
  }
  func.func @transform_0(%arg0: i32, %arg1: i32) -> (i32, i32, i32, i32) {
    %c0_i32 = arith.constant 0 : i32
    %c0_i32_0 = arith.constant 0 : i32
    %c0_i32_1 = arith.constant 0 : i32
    return %arg0, %c0_i32, %c0_i32_0, %arg1 : i32, i32, i32, i32
  }
  func.func @transform_1(%arg0: i32, %arg1: i32) -> (i32, i32, i32) {
    %c0_i32 = arith.constant 0 : i32
    %c0_i32_0 = arith.constant 0 : i32
    %c0_i32_1 = arith.constant 0 : i32
    return %arg0, %c0_i32, %c0_i32_0 : i32, i32, i32
  }
}

</mosaic_0001>

<bundles_post_ra>
// kernel: tpu_custom_call.1
= control target key start
LH: loop header
LB: loop body
LE: loop exit
PB: predicated region body
PF: predicated region fallthrough
CT: control target
= control target key end

     0   :  { %6 = vsyncpa [#allocation3], 0  ;;  %s668_s0 = inlined_call_operand.hbm [shape: f32[3,2,8,32], index: 0, kind: input, shape index: {}]   ;;  %s669_s1 = inlined_call_operand.hbm [shape: f32[3,2,8], index: 1, kind: output, shape index: {}]  }
   0x1   :  { %8 = vsyncpa [#allocation3 + $0x1], 0 }
   0x2   :  { %9 = vsyncpa [#allocation4], 0 }
   0x3   :  { %11 = vsyncpa [#allocation4 + $0x1], 0  ;;  %s493_s6 = smov 0   ;;  %s495_s7 = smov 0  }
   0x4   :  { %s497_s8 = smov 0   ;;  %s499_s9 = smov 0  }
   0x5   :  { %s501_s10 = smov 0   ;;  %s503_s11 = smov 0  }
   0x6 LB: > { %s284_s12 = sadd.s32 4294967295, %s476_s11   ;;  %s285_s13 = sadd.s32 4294967294, %s476_s11   ;;  %s476_s11 = sphi %s503_s11, %s17_s11   ;;  %s472_s10 = sphi %s501_s10, %s683_s10   ;;  %s468_s9 = sphi %s499_s9, %s682_s9   ;;  %s464_s8 = sphi %s497_s8, %s681_s8   ;;  %s460_s7 = sphi %s495_s7, %s680_s7   ;;  %s456_s6 = sphi %s493_s6, %s679_s6  }
   0x7   : > { %s29_s14 = sadd.s32 1, %s472_s10  ;;  %s38_s15 = sadd.s32 1, %s464_s8 }
   0x8   : > { %p31_p0 = scmp.ge.s32.totalorder %s29_s14, 3  ;;  %p45_p1 = scmp.ne.s32.totalorder %s464_s8, %s460_s7 }
   0x9   : > { %p46_p2 = scmp.eq.s32.totalorder %s476_s11, 0  ;;  %p51_p3 = scmp.ne.s32.totalorder %s460_s7, %s456_s6 }
   0xa   : > { %s685_s14 = smov (%p31_p0, %s29_s14), 0  ;;  %p52_p5 = scmp.eq.s32.totalorder %s284_s12, 0 }
   0xb   : > { %p534_p4 = por %p46_p2, %p45_p1  ;;  %s33_s17 = ssub.s32 %s472_s10, %s685_s14 }
   0xc   : > { %p75_p6 = scmp.eq.s32.totalorder %s284_s12, 2  ;;  %p36_p7 = scmp.eq.s32.totalorder %s33_s17, 0 }
   0xd   : > { %p540_p8 = por %p52_p5, %p51_p3  ;;  %p81_p10 = scmp.eq.s32.totalorder %s285_s13, 2 }
   0xe   : > { %p544_p9 = por %p75_p6, %p45_p1  ;;  %p311_p12 = scmp.lt.s32.totalorder %s476_s11, 3 }
   0xf   : > { %s549_s20 = scalar_select %p36_p7, %s464_s8, %s38_s15  }
  0x10   : > { %s673_s19 = scalar_select %p544_p9, 1, 0 }
  0x11   : > { %p551_p11 = por %p81_p10, %p51_p3  ;;  %s101_s22 = sand.u32 1, %s464_s8  }
  0x12   : > { %s288_s23 = sshll.u32 %s101_s22, 4  ;;  %s298_s24 = sshll.u32 %s472_s10, 8 }
  0x13   : > { %s674_s21 = scalar_select %p551_p11, 1, 0 }
  0x14   : > { %s561_s27 = scalar_lea.hbm %s668_s0, %s298_s24  ;;  %s105_s28 = scalar_lea.vmem [#allocation2], %s288_s23 }
  0x15   : > { %s113_s29 = sshll.u32 %s105_s28, 4  ;;  %p567_p13 = pnand %p311_p12, %p534_p4  ;;  %s563_s29 = int_to_ptr.vmem [resolvable:$true] %s113_s29 }
  0x16   : > { %s572_s2 = scalar_lea.sflag [#allocation3], %s101_s22  ;;  %s364_s3 = scalar_lea.hbm %s561_s27, 256 }
  0x17   : > { %p365_p1 = scmp.ne.s32.totalorder %s561_s27, %s364_s3  ;;  %p366_p2 = pneg %p567_p13 }
  0x18   : > { %s369_s12 = scalar_lea.hbm %s668_s0, 768  ;;  %p370_p4 = scmp.lt.u32.totalorder %s561_s27, %s668_s0 }
  0x19   : > { %p367_p3 = pnand %p366_p2, %p365_p1  ;;  %p371_p6 = scmp.lt.u32.totalorder %s369_s12, %s364_s3 }
  0x1a   : > { %p373_p10 = scmp.lt.u32.totalorder %s364_s3, %s561_s27 }
  0x1b   : > { %p368_p5 = pneg %p367_p3  ;;  %p372_p7 = por %p371_p6, %p370_p4 }
  0x1d   : > { %p374_p12 = por %p373_p10, %p372_p7 }
  0x1f   : > { %p375_p0 = pnand %p374_p12, %p368_p5 }
  0x21   : > { %378 = shalt.err (!%p375_p0)
}
  0x22   : > { %s379_s16 = scalar_lea.vmem %s563_s29, 256  ;;  %s478_s17 = smov [#allocation2]  }
  0x23   : > { %p380_p1 = scmp.ne.s32.totalorder %s563_s29, %s379_s16  ;;  %s384_s22 = sshll.u32 %s478_s17, 4  ;;  %s385_s22 = int_to_ptr.vmem [resolvable:$false] %s384_s22 }
  0x24   : > { %s386_s23 = scalar_lea.vmem %s385_s22, 512  ;;  %p387_p9 = scmp.lt.s32.totalorder %s563_s29, %s385_s22 }
  0x25   : > { %p382_p3 = pnand %p380_p1, %p366_p2  ;;  %p388_p4 = scmp.lt.s32.totalorder %s386_s23, %s379_s16 }
  0x27   : > { %p383_p11 = pneg %p382_p3  ;;  %p389_p6 = por %p388_p4, %p387_p9 }
  0x29   : > { %p390_p7 = pnand %p389_p6, %p383_p11 }
  0x2b   : > { %393 = shalt.err (!%p390_p7)
}
  0x2c   : > { %s479_s24 = smov 128   ;;  %s480_s25 = smov 8  }
  0x2d   : > { %306 = dma.hbm_to_vmem [thread:$0]  (!%p567_p13), %s561_s27, 256, %s563_s29, %s572_s2, %s479_s24, %s479_s24, %s480_s25  }
  0x2e   : > { %p121_p0 = scmp.lt.s32.totalorder %s476_s11, 4  ;;  %p676_p2 = scmp.ge.s32.totalorder %s476_s11, 1 }
  0x30   : > { %p122_p5 = pnand %p676_p2, %p121_p0 }
  0x31   : > { %s604_s26 = sand.u32 (!%p122_p5), 1, %s460_s7  }
  0x32   : > { %125 = sbr.rel (%p122_p5) target bundleno = 235 (0xeb), region = 24  ;;  %s292_s28 = sshll.u32 (!%p122_p5), %s604_s26, 4 }
  0x33   : > { %s128_s3 = scalar_lea.sflag (!%p122_p5), [#allocation3], %s604_s26  ;;  %s131_s4 = scalar_lea.vmem (!%p122_p5), [#allocation2], %s292_s28 }
  0x39   : > { %447 = dma.done.wait (%p540_p8), %s128_s3, 256  }
  0x3a   : > { %449 = vsyncadd (%p540_p8), %s128_s3, 4294967040  ;;  %vm159_vm0 = vcmask 261120   ;;  %v157_v0 = vld [vmem:[%s131_s4] sm:$0xff]  ;;  %v158_v1 = vld [vmem:[%s131_s4 + $0x8] sm:$0xff]  ;;  %s293_s27 = sshll.u32 %s604_s26, 1  ;;  %vm154_vm1 = vcmask 58368   ;;  %v168_v5 = vlaneseq }
  0x3b   : > { %v160_v2 = vsel %vm159_vm0, %v157_v0, 0.0  ;;  %v163_v3 = vsel %vm159_vm0, %v158_v1, 0.0  ;;  %s149_s29 = scalar_lea.vmem [#allocation5], %s293_s27  ;;  %v481_v4 = vmov 0.0   ;;  %vm178_vm2 = vcmask 1041409   ;;  %s295_s18 = sshll.u32 %s468_s9, 5 }
  0x3c   : > { %161 = vadd.xlane.f32.xlu0 %v160_v2  ;;  %155 = vst.msk [vmem:[%s149_s29] sm:$0x3] %vm154_vm1, %v481_v4  ;;  %v169_v6 = vand.u32 127, %v168_v5  ;;  %v171_v7 = vshrl.u32 %v168_v5, 7  ;;  %s204_s30 = sshll.u32 %s149_s29, 4  ;;  %s619_s12 = scalar_lea.hbm %s669_s1, %s295_s18  ;;  %s621_s30 = int_to_ptr.vmem [resolvable:$true] %s204_s30 }
  0x3d   : > { %s191_s13 = scalar_lea.sflag [#allocation4], %s604_s26  ;;  %s394_s15 = scalar_lea.vmem %s621_s30, 32 }
  0x3e   : > { %v172_v9 = vsub.s32 %v169_v6, %v171_v7  ;;  %p395_p8 = scmp.ne.s32.totalorder %s621_s30, %s394_s15  ;;  %p677_p9 = scmp.ne.s32.totalorder %s673_s19, 0 }
  0x3f   : > { %s482_s9 = smov [#allocation5]  }
  0x40   : > { %164 = vadd.xlane.f32.xlu0 %v163_v3  ;;  %p396_p11 = pnand %p395_p8, %p677_p9  ;;  %s398_s16 = sshll.u32 %s482_s9, 4  ;;  %s399_s16 = int_to_ptr.vmem [resolvable:$false] %s398_s16 }
  0x41   : > { %s400_s17 = scalar_lea.vmem %s399_s16, 64  ;;  %p401_p10 = scmp.lt.s32.totalorder %s621_s30, %s399_s16 }
  0x42   : > { %p397_p13 = pneg %p396_p11  ;;  %p402_p12 = scmp.lt.s32.totalorder %s400_s17, %s394_s15 }
  0x43   : > { %v156_v12 = vld [vmem:[%s149_s29] sm:$0x3] }
  0x44   : > { %p403_p1 = por %p402_p12, %p401_p10 }
  0x46   : > { %p404_p3 = pnand %p403_p1, %p397_p13 }
  0xc9   : > { %v162_v8 = vpop.xlane.xlu0 %161 }
  0xca   : > { %v173_v11 = vrot.slane %v162_v8, %v172_v9 }
  0xcd   : > { %v165_v10 = vpop.xlane.xlu0 %164 }
  0xce   : > { %v177_v13 = vrot.slane %v165_v10, %v172_v9 }
  0xd0   : > { %v179_v14 = vsel %vm178_vm2, %v177_v13, %v173_v11 }
  0xd1   : > { %v181_v15 = vadd.f32 %v179_v14, %v156_v12 }
  0xd3   : > { %183 = vst.msk [vmem:[%s149_s29] sm:$0x3] %vm154_vm1, %v181_v15 }
  0xda   : > { %v187_v16 = vld [vmem:[%s149_s29] sm:$0x3] }
  0xdb   : > { %v188_v17 = vmul.f32 0.03125, %v187_v16 }
  0xdd   : > { %189 = vst.msk [vmem:[%s149_s29] sm:$0x3] %vm154_vm1, %v188_v17 }
  0xde   : > { %407 = shalt.err (!%p404_p3)
}
  0xdf   : > { %s408_s22 = scalar_lea.hbm %s619_s12, 32  ;;  %s412_s25 = scalar_lea.hbm %s669_s1, 96 }
  0xe0   : > { %p409_p4 = scmp.ne.s32.totalorder %s619_s12, %s408_s22  ;;  %p413_p0 = scmp.lt.u32.totalorder %s619_s12, %s669_s1 }
  0xe1   : > { %p414_p2 = scmp.lt.u32.totalorder %s412_s25, %s408_s22  ;;  %p416_p8 = scmp.lt.u32.totalorder %s408_s22, %s619_s12 }
  0xe2   : > { %p410_p6 = pnand %p409_p4, %p677_p9 }
  0xe3   : > { %p415_p5 = por %p414_p2, %p413_p0 }
  0xe4   : > { %p411_p7 = pneg %p410_p6 }
  0xe5   : > { %p417_p11 = por %p416_p8, %p415_p5 }
  0xe7   : > { %p418_p13 = pnand %p417_p11, %p411_p7 }
  0xe9   : > { %421 = shalt.err (!%p418_p13)
}
  0xea   : > { %301 = dma.vmem_to_hbm [thread:$0]  (%p677_p9), %s621_s30, 32, %s619_s12, %s191_s13  }
  0xeb PF: > { %p312_p10 = scmp.ge.s32.totalorder %s476_s11, 2  ;;  %s216_s3 = sand.u32 1, %s456_s6  }
  0xec   : > { %p678_p12 = scmp.ne.s32.totalorder %s674_s21, 0  ;;  %s217_s4 = scalar_lea.sflag [#allocation4], %s216_s3 }
  0xee   : > { %p308_p1 = pnand %p312_p10, %p678_p12 }
  0xf0   : > { %451 = dma.done.wait (!%p308_p1), %s217_s4, 32  }
  0xf1   : > { %453 = vsyncadd (!%p308_p1), %s217_s4, 4294967264  ;;  %s17_s11 = sadd.s32 1, %s476_s11   ;;  %s679_s6 = smov %s460_s7 }
  0xf2   : > { %p14_p3 = scmp.ge.s32.totalorder %s17_s11, 5   ;;  %s680_s7 = smov %s464_s8 }
  0xf3   : > { %s681_s8 = smov %s549_s20  ;;  %s682_s9 = smov %s472_s10 }
  0xf4   : > { %s683_s10 = smov %s685_s14  ;;  %16 = sbr.rel (!%p14_p3) target bundleno = 6 (0x6), region = 77 }
  0xfb   :  { %222 = vsyncpa [#allocation3], 1 }
  0xfc   :  { %224 = vsyncpa [#allocation3 + $0x1], 1 }
  0xfd   :  { %225 = vsyncpa [#allocation4], 1 }
  0xfe   :  { %227 = vsyncpa [#allocation4 + $0x1], 1 }

</bundles_post_ra>
